<compile_context>
chip_gen: v5e
topology: v5e:2x2
jax: 0.10.0
libtpu: 0.0.40
codegen_flags: <defaults>
</compile_context>

<pallas_src>
import functools

import jax
import jax.numpy as jnp
from jax.experimental import pallas as pl
from jax.experimental.pallas import tpu as pltpu

ALL_AVE = 1.23          # `ave` constructor default
PDIST_EPS = 1e-6        # nn.PairwiseDistance default eps (added to the difference)


def _round_up(x, m):
    return ((x + m - 1) // m) * m


def _cdiv(a, b):
    return (a + b - 1) // b


def amcf_kernel(in_ref, w_ref, out_ref, *, A, E, RI, RA, RBIAS, WA, WAT, WEF, WBE):
    """All per-row data is transposed: batch is on the lane (last) axis."""
    u = in_ref[0:E, :]                   # [E, TB]  user latent
    it = in_ref[RI:RI + E, :]            # [E, TB]  item latent (== detached latent)
    asp = in_ref[RA:RA + A, :]           # [A, TB]  aspect indicators
    bias = in_ref[RBIAS:RBIAS + 1, :]    # [1, TB]  u_bias + i_bias + ave (pre-summed)

    # Weight slab (resident in VMEM): every section starts on an 8-row boundary.
    w_asp = w_ref[WA:WA + A, 0:E]        # [A, E]   aspect embedding
    w_asp_t = w_ref[WAT:WAT + E, 0:A]    # [E, A]   its transpose
    w_eff_t = w_ref[WEF:WEF + A, 0:E]    # [A, E]   collapsed-MLP weight, transposed
    b_eff = w_ref[WBE:WBE + A, 0:1]      # [A, 1]   collapsed-MLP bias (column)

    # rating = (u * it).sum(E) + u_bias + i_bias + ave                 -> [1, TB]
    rating = jnp.sum(u * it, axis=0, keepdims=True) + bias

    # asp_weight = softmax(collapsed MLP(detached item latent)) over A -> [A, TB]
    logits = jnp.dot(w_eff_t, it, preferred_element_type=jnp.float32) + b_eff
    m = jnp.max(logits, axis=0, keepdims=True)
    e = jnp.exp(logits - m)
    aw = e / jnp.sum(e, axis=0, keepdims=True)

    # item_asp = bmm(asp_latent^T, asp_weight) = asp_W^T @ (asp * aw)  -> [E, TB]
    item_asp = jnp.dot(w_asp_t, asp * aw, preferred_element_type=jnp.float32)

    # sim = ||item_asp - item_latent + eps||_2 per column              -> [1, TB]
    diff = item_asp - it + PDIST_EPS
    sim = jnp.sqrt(jnp.sum(diff * diff, axis=0, keepdims=True))

    # pref = bmm(asp_latent, user_latent) = asp * (asp_W @ u)          -> [A, TB]
    pref = asp * jnp.dot(w_asp, u, preferred_element_type=jnp.float32)

    # Packed lane-dense output [A+2, TB] (= exactly one 8-sublane tile for A=6).
    out_ref[0:A, :] = pref
    out_ref[A:A + 1, :] = rating
    out_ref[A + 1:A + 2, :] = sim


def prepare_weights(params):
    """Collapse the activation-free MLP and pack all constant weights into one
    sublane-aligned slab.  Call once per parameter update, not per forward."""
    E = params["user_emb"].shape[1]
    A = params["asp_W"].shape[0]

    # Linear->Linear->Linear with no nonlinearity collapses to one affine map.
    W_eff = params["W1"] @ params["W2"] @ params["W3"]                       # [E, A]
    b_eff = (params["b1"] @ params["W2"] @ params["W3"]
             + params["b2"] @ params["W3"] + params["b3"])                   # [1, A]

    WA = 0
    WAT = _round_up(A, 8)
    WEF = WAT + _round_up(E, 8)
    WBE = WEF + _round_up(A, 8)
    rows = _round_up(WBE + A, 8)
    cols = max(E, A)

    slab = jnp.zeros((rows, cols), jnp.float32)
    slab = slab.at[WA:WA + A, 0:E].set(params["asp_W"].astype(jnp.float32))
    slab = slab.at[WAT:WAT + E, 0:A].set(params["asp_W"].T.astype(jnp.float32))
    slab = slab.at[WEF:WEF + A, 0:E].set(W_eff.T.astype(jnp.float32))
    slab = slab.at[WBE:WBE + A, 0:1].set(b_eff.reshape(A, 1).astype(jnp.float32))

    offs = {"WA": WA, "WAT": WAT, "WEF": WEF, "WBE": WBE}
    return slab, offs


def _choose_tb(B):
    """Lane-axis batch tile: multiple of 128, >=4 grid steps for medium/large
    batches (v7x has 2 TensorCores), capped so a double-buffered step stays a
    few MiB (fits v5e 16 MiB scoped VMEM and v7x 64 MiB physical VMEM)."""
    bp0 = _round_up(B, 128)
    tb = _round_up(_cdiv(bp0, 4), 128)
    return int(min(8192, max(128, tb)))


def amcf_forward(params, x, y, asp, *, tb=None, weights=None):
    """x, y: int32 [B] ids; asp: float32 [B, num_asp].
    Returns (out[B], sim[B], pref[B, num_asp])."""
    if weights is None:
        weights = prepare_weights(params)
    w_slab, woffs = weights

    # Gather glue (data-dependent embedding lookups stay in plain JAX).
    user_lat = params["user_emb"][x].astype(jnp.float32)       # [B, E]
    item_lat = params["item_emb"][y].astype(jnp.float32)       # [B, E]
    bias_sum = (params["u_bias"][x] + params["i_bias"][y] + ALL_AVE).astype(jnp.float32)

    B, E = user_lat.shape
    A = asp.shape[1]

    if tb is None:
        tb = _choose_tb(B)
    tb = _round_up(tb, 128)
    Bp = _round_up(B, tb)

    # Input slab layout (rows; every section starts on an 8-sublane boundary).
    RI = _round_up(E, 8)                 # item latent rows
    RA = RI + _round_up(E, 8)            # aspect rows
    RBIAS = RA + _round_up(A, 8)         # summed-bias row
    RTOT = _round_up(RBIAS + 1, 8)

    in_slab = jnp.zeros((RTOT, Bp), jnp.float32)
    in_slab = in_slab.at[0:E, :B].set(user_lat.T)
    in_slab = in_slab.at[RI:RI + E, :B].set(item_lat.T)
    in_slab = in_slab.at[RA:RA + A, :B].set(asp.astype(jnp.float32).T)
    in_slab = in_slab.at[RBIAS, :B].set(bias_sum)

    WR, WC = w_slab.shape
    grid = (Bp // tb,)

    kern = functools.partial(
        amcf_kernel, A=A, E=E, RI=RI, RA=RA, RBIAS=RBIAS,
        WA=woffs["WA"], WAT=woffs["WAT"], WEF=woffs["WEF"], WBE=woffs["WBE"])

    packed = pl.pallas_call(
        kern,
        out_shape=jax.ShapeDtypeStruct((A + 2, Bp), jnp.float32),
        grid=grid,
        in_specs=[
            pl.BlockSpec((RTOT, tb), lambda i: (0, i)),   # batch slab (lane = batch)
            pl.BlockSpec((WR, WC), lambda i: (0, 0)),     # resident weight slab
        ],
        out_specs=pl.BlockSpec((A + 2, tb), lambda i: (0, i)),
        compiler_params=pltpu.CompilerParams(
            dimension_semantics=("parallel",)),
    )(in_slab, w_slab)

    pref = packed[:A, :B].T               # [B, A]
    out = packed[A, :B]                   # [B]
    sim = packed[A + 1, :B]               # [B]
    return out, sim, pref


def init_params(key, num_user, num_item, num_asp=6, e_dim=16):
    ks = jax.random.split(key, 10)
    p = {
        "user_emb": jax.random.normal(ks[0], (num_user, e_dim), jnp.float32),
        "item_emb": jax.random.normal(ks[1], (num_item, e_dim), jnp.float32),
        "u_bias":   jax.random.normal(ks[2], (num_user,), jnp.float32),
        "i_bias":   jax.random.normal(ks[3], (num_item,), jnp.float32),
        "asp_W":    jax.random.normal(ks[4], (num_asp, e_dim), jnp.float32),
        # MLP: Linear(E,50) -> Linear(50,25) -> Linear(25,num_asp); stored [in,out].
        # The PyTorch module has NO nonlinearity between the Linear layers, so the
        # wrapper legally collapses them into a single affine map.
        "W1": jax.random.normal(ks[5], (e_dim, 50), jnp.float32) * 0.1,
        "b1": jax.random.normal(ks[6], (1, 50), jnp.float32) * 0.1,
        "W2": jax.random.normal(ks[7], (50, 25), jnp.float32) * 0.1,
        "b2": jnp.zeros((1, 25), jnp.float32),
        "W3": jax.random.normal(ks[8], (25, num_asp), jnp.float32) * 0.1,
        "b3": jnp.zeros((1, num_asp), jnp.float32),
    }
    return p


def amcf_reference(params, x, y, asp):
    """Pure-JAX reference mirroring the PyTorch forward (un-collapsed MLP)."""
    u = params["user_emb"][x]
    it = params["item_emb"][y]
    out = jnp.sum(u * it, -1) + params["u_bias"][x] + params["i_bias"][y] + ALL_AVE
    h = it @ params["W1"] + params["b1"]
    h = h @ params["W2"] + params["b2"]
    aw = jax.nn.softmax(h @ params["W3"] + params["b3"], axis=-1)        # [B, A]
    asp_latent = asp[:, :, None] * params["asp_W"][None, :, :]           # [B, A, E]
    item_asp = jnp.einsum("bae,ba->be", asp_latent, aw)                  # [B, E]
    sim = jnp.sqrt(jnp.sum((item_asp - it + PDIST_EPS) ** 2, -1))
    pref = jnp.einsum("bae,be->ba", asp_latent, u)
    return out, sim, pref


if __name__ == "__main__":
    num_user, num_item, num_asp, e_dim, batch = 10, 12, 6, 16, 8

    key = jax.random.PRNGKey(0)
    k_params, k_x, k_y, k_asp = jax.random.split(key, 4)

    params = init_params(k_params, num_user, num_item, num_asp, e_dim)
    x = jax.random.randint(k_x, (batch,), 0, num_user, dtype=jnp.int32)
    y = jax.random.randint(k_y, (batch,), 0, num_item, dtype=jnp.int32)
    asp = jax.random.uniform(k_asp, (batch, num_asp), jnp.float32)

    # Hoisted once per parameter update (perf feedback): collapse MLP + pack slab.
    weights = prepare_weights(params)

    out, sim, pref = jax.block_until_ready(
        amcf_forward(params, x, y, asp, weights=weights))

    # sanity check against pure-JAX reference
    ro, rs, rp = amcf_reference(params, x, y, asp)
    assert jnp.allclose(out, ro, atol=1e-4), "rating mismatch"
    assert jnp.allclose(sim, rs, atol=1e-4), "sim mismatch"
    assert jnp.allclose(pref, rp, atol=1e-4), "pref mismatch"

    print("KERNEL_OK")
</pallas_src>

<mosaic_0001>
module attributes {stable_mosaic.version = 11 : i64} {
  func.func @amcf_kernel(%arg0: i32, %arg1: memref<48x128xf32, #tpu.memory_space<vmem>>, %arg2: memref<40x16xf32, #tpu.memory_space<vmem>>, %arg3: memref<8x128xf32, #tpu.memory_space<vmem>>) attributes {dimension_semantics = [#tpu.dimension_semantics<parallel>], iteration_bounds = array<i64: 1>, scalar_prefetch = 0 : i64, scratch_operands = 0 : i64, tpu.core_type = #tpu.core_type<tc>, window_params = [{transform_indices = @transform_0, window_bounds = array<i64: 48, 128>}, {pipeline_mode = #tpu.pipeline_mode<synchronous>, transform_indices = @transform_1, window_bounds = array<i64: 40, 16>}, {transform_indices = @transform_2, window_bounds = array<i64: 8, 128>}]} {
    %c0 = arith.constant 0 : index
    %c0_0 = arith.constant 0 : index
    %0 = vector.load %arg1[%c0, %c0_0] : memref<48x128xf32, #tpu.memory_space<vmem>>, vector<16x128xf32>
    %c16 = arith.constant 16 : index
    %c0_1 = arith.constant 0 : index
    %1 = vector.load %arg1[%c16, %c0_1] : memref<48x128xf32, #tpu.memory_space<vmem>>, vector<16x128xf32>
    %c32 = arith.constant 32 : index
    %c0_2 = arith.constant 0 : index
    %2 = vector.load %arg1[%c32, %c0_2] : memref<48x128xf32, #tpu.memory_space<vmem>>, vector<6x128xf32>
    %c40 = arith.constant 40 : index
    %c0_3 = arith.constant 0 : index
    %3 = vector.load %arg1[%c40, %c0_3] : memref<48x128xf32, #tpu.memory_space<vmem>>, vector<1x128xf32>
    %c0_4 = arith.constant 0 : index
    %c0_5 = arith.constant 0 : index
    %4 = vector.load %arg2[%c0_4, %c0_5] : memref<40x16xf32, #tpu.memory_space<vmem>>, vector<6x16xf32>
    %c8 = arith.constant 8 : index
    %c0_6 = arith.constant 0 : index
    %5 = vector.load %arg2[%c8, %c0_6] : memref<40x16xf32, #tpu.memory_space<vmem>>, vector<16x6xf32>
    %c24 = arith.constant 24 : index
    %c0_7 = arith.constant 0 : index
    %6 = vector.load %arg2[%c24, %c0_7] : memref<40x16xf32, #tpu.memory_space<vmem>>, vector<6x16xf32>
    %c32_8 = arith.constant 32 : index
    %c0_9 = arith.constant 0 : index
    %7 = vector.load %arg2[%c32_8, %c0_9] : memref<40x16xf32, #tpu.memory_space<vmem>>, vector<6x1xf32>
    %8 = arith.mulf %0, %1 : vector<16x128xf32>
    %cst = arith.constant dense<0.000000e+00> : vector<128xf32>
    %9 = vector.multi_reduction <add>, %8, %cst [0] : vector<16x128xf32> to vector<128xf32>
    %10 = vector.shape_cast %9 : vector<128xf32> to vector<1x128xf32>
    %11 = arith.addf %10, %3 : vector<1x128xf32>
    %cst_10 = arith.constant dense<0.000000e+00> : vector<6x128xf32>
    %12 = tpu.matmul %6, %1, %cst_10 {dimension_numbers = #tpu.dot_dimension_numbers<[1], [0], [0], [1], [0, 0, 1, 1], [], []>} : vector<6x16xf32>, vector<16x128xf32>, vector<6x128xf32> -> vector<6x128xf32>
    %13 = vector.broadcast %7 : vector<6x1xf32> to vector<6x128xf32>
    %14 = arith.addf %12, %13 : vector<6x128xf32>
    %cst_11 = arith.constant dense<0xFF800000> : vector<128xf32>
    %15 = vector.multi_reduction <maximumf>, %14, %cst_11 [0] : vector<6x128xf32> to vector<128xf32>
    %16 = vector.shape_cast %15 : vector<128xf32> to vector<1x128xf32>
    %17 = vector.broadcast %16 : vector<1x128xf32> to vector<6x128xf32>
    %18 = arith.subf %14, %17 : vector<6x128xf32>
    %19 = math.exp %18 : vector<6x128xf32>
    %cst_12 = arith.constant dense<0.000000e+00> : vector<128xf32>
    %20 = vector.multi_reduction <add>, %19, %cst_12 [0] : vector<6x128xf32> to vector<128xf32>
    %21 = vector.shape_cast %20 : vector<128xf32> to vector<1x128xf32>
    %22 = vector.broadcast %21 : vector<1x128xf32> to vector<6x128xf32>
    %23 = arith.divf %19, %22 : vector<6x128xf32>
    %24 = arith.mulf %2, %23 : vector<6x128xf32>
    %cst_13 = arith.constant dense<0.000000e+00> : vector<16x128xf32>
    %25 = tpu.matmul %5, %24, %cst_13 {dimension_numbers = #tpu.dot_dimension_numbers<[1], [0], [0], [1], [0, 0, 1, 1], [], []>} : vector<16x6xf32>, vector<6x128xf32>, vector<16x128xf32> -> vector<16x128xf32>
    %26 = arith.subf %25, %1 : vector<16x128xf32>
    %cst_14 = arith.constant 9.99999997E-7 : f32
    %27 = vector.broadcast %cst_14 : f32 to vector<16x128xf32>
    %28 = arith.addf %26, %27 : vector<16x128xf32>
    %29 = arith.mulf %28, %28 : vector<16x128xf32>
    %cst_15 = arith.constant dense<0.000000e+00> : vector<128xf32>
    %30 = vector.multi_reduction <add>, %29, %cst_15 [0] : vector<16x128xf32> to vector<128xf32>
    %31 = vector.shape_cast %30 : vector<128xf32> to vector<1x128xf32>
    %32 = math.sqrt %31 : vector<1x128xf32>
    %cst_16 = arith.constant dense<0.000000e+00> : vector<6x128xf32>
    %33 = tpu.matmul %4, %0, %cst_16 {dimension_numbers = #tpu.dot_dimension_numbers<[1], [0], [0], [1], [0, 0, 1, 1], [], []>} : vector<6x16xf32>, vector<16x128xf32>, vector<6x128xf32> -> vector<6x128xf32>
    %34 = arith.mulf %2, %33 : vector<6x128xf32>
    %c0_17 = arith.constant 0 : index
    %c0_18 = arith.constant 0 : index
    %35 = vector.load %arg3[%c0_17, %c0_18] : memref<8x128xf32, #tpu.memory_space<vmem>>, vector<6x128xf32>
    tpu.vector_store %arg3[%c0_17, %c0_18], %34 {strides = array<i32>} : memref<8x128xf32, #tpu.memory_space<vmem>>, vector<6x128xf32>,
    %c6 = arith.constant 6 : index
    %c0_19 = arith.constant 0 : index
    %36 = vector.load %arg3[%c6, %c0_19] : memref<8x128xf32, #tpu.memory_space<vmem>>, vector<1x128xf32>
    tpu.vector_store %arg3[%c6, %c0_19], %11 {strides = array<i32>} : memref<8x128xf32, #tpu.memory_space<vmem>>, vector<1x128xf32>,
    %c7 = arith.constant 7 : index
    %c0_20 = arith.constant 0 : index
    %37 = vector.load %arg3[%c7, %c0_20] : memref<8x128xf32, #tpu.memory_space<vmem>>, vector<1x128xf32>
    tpu.vector_store %arg3[%c7, %c0_20], %32 {strides = array<i32>} : memref<8x128xf32, #tpu.memory_space<vmem>>, vector<1x128xf32>,
    return
  }
  func.func @transform_0(%arg0: i32) -> (i32, i32) {
    %c0_i32 = arith.constant 0 : i32
    %c0_i32_0 = arith.constant 0 : i32
    return %c0_i32, %arg0 : i32, i32
  }
  func.func @transform_1(%arg0: i32) -> (i32, i32) {
    %c0_i32 = arith.constant 0 : i32
    %c0_i32_0 = arith.constant 0 : i32
    %c0_i32_1 = arith.constant 0 : i32
    return %c0_i32, %c0_i32_0 : i32, i32
  }
  func.func @transform_2(%arg0: i32) -> (i32, i32) {
    %c0_i32 = arith.constant 0 : i32
    %c0_i32_0 = arith.constant 0 : i32
    return %c0_i32, %arg0 : i32, i32
  }
}

</mosaic_0001>

<bundles_post_ra>
// kernel: tpu_custom_call.1
= control target key start
LH: loop header
LB: loop body
LE: loop exit
PB: predicated region body
PF: predicated region fallthrough
CT: control target
= control target key end

     0   :  { %vm38_vm0 = vcmask 130048   ;;  %v238_v3 = vmov 0   ;;  %s307_s0 = inlined_call_operand.vmem [shape: f32[48,128], index: 0, kind: input, shape index: {}]   ;;  %s308_s1 = inlined_call_operand.vmem [shape: f32[40,16], index: 1, kind: input, shape index: {}]   ;;  %s309_s2 = inlined_call_operand.hbm [shape: f32[8,128], index: 2, kind: output, shape index: {}]  }
   0x1   :  { %v258_v0 = vld [vmem:[%s307_s0 + $0x18] sm:$0xff]  ;;  %v263_v1 = vld [vmem:[%s307_s0 + $0x10] sm:$0xff]  ;;  %205 = vset.pattern.permute.xlu0 %v238_v3  ;;  %v22_v4 = vld [vmem:[%s308_s1 + $0x20] sm:$0x3f] }
   0x2   :  { %v21_v2 = vld [vmem:[%s308_s1 + $0x18] sm:$0x3f]  ;;  %56 = vmatpush.msra.mxu0 %v258_v0 }
   0x3   :  { %7 = vsyncpa [#allocation3], 0  ;;  %35 = vperm.xlu0 %205, %v22_v4   ;;  %vm62_vm1 = vcmask 1045504   ;;  %v13_v21 = vld [vmem:[%s307_s0 + $0x8] sm:$0xff]  ;;  %v12_v22 = vld [vmem:[%s307_s0] sm:$0xff]  ;;  %vm96_vm6 = vcmask 48128  }
   0x4   :  { %57 = vmatpush.msra.mxu0 %v263_v1  ;;  %v24_v23 = vmul.f32 %v258_v0, %v13_v21  ;;  %171 = vmatpush.msra.mxu2 %v13_v21  ;;  %v23_v24 = vmul.f32 %v263_v1, %v12_v22  ;;  %v18_v25 = vld [vmem:[%s308_s1] sm:$0x3f]  ;;  %v20_v44 = vld [vmem:[%s308_s1 + $0x10] sm:$0xff]  ;;  %v19_v45 = vld [vmem:[%s308_s1 + $0x8] sm:$0xff]  ;;  %s188_s5 = sshll.u32 %s309_s2, 4  ;;  %s189_s5 = int_to_ptr.hbm [resolvable:$true] %s188_s5 }
   0x5   :  { %197 = vmatmul.msk.f32.vlgmr.msra.gmra.mxu0 %vm38_vm0, %v21_v2  ;;  %v16_v40 = vld [vmem:[%s307_s0 + $0x20] sm:$0x3f]  ;;  %v17_v53 = vld [vmem:[%s307_s0 + $0x28] sm:$0x1]  ;;  %s239_s0 = smov [#allocation2]  }
   0x6   :  { %v25_v27 = vadd.f32 %v24_v23, %v23_v24  ;;  %172 = vmatpush.msra.mxu2 %v12_v22  ;;  %s186_s1 = sshll.u32 %s239_s0, 4  ;;  %s187_s1 = int_to_ptr.vmem [resolvable:$true] %s186_s1 }
   0x7   :  { %201 = vmatmul.msk.f32.vlgmr.msra.gmra.mxu2 %vm38_vm0, %v18_v25 }
   0x8   :  { %v26_v46 = vrot.slane %v25_v27, 4 }
   0xa   :  { %v27_v47 = vadd.f32 %v26_v46, %v25_v27 }
   0xc   :  { %v28_v48 = vrot.slane %v27_v47, 2 }
   0xe   :  { %v29_v49 = vadd.f32 %v28_v48, %v27_v47 }
  0x10   :  { %v30_v50 = vrot.slane %v29_v49, 1 }
  0x12   :  { %v31_v51 = vadd.f32 %v30_v50, %v29_v49 }
  0x14   :  { %v32_v55 = vadd.f32 %v31_v51, %v17_v53 }
  0x16   :  { %179 = vst [vmem:[#allocation2 + $0x6] sm:$0x1] %v32_v55 }
  0x75   :  { %v36_v5 = vpop.permute.xlu0 %35 }
  0x82   :  { %v59_v6 = vpop.f32.mrf.mxu0 }
  0x83   :  { %v60_v7 = vadd.f32 %v59_v6, %v36_v5 }
  0x85   :  { %v63_v8 = vsel %vm62_vm1, %v60_v7, -inf }
  0x86   :  { %v64_v9 = vrot.slane %v63_v8, 4 }
  0x88   :  { %v65_v10 = vmax.f32 %v63_v8, %v64_v9 }
  0x8a   :  { %v66_v11 = vrot.slane %v65_v10, 2  ;;  %v174_v52 = vpop.f32.mrf.mxu2 }
  0x8b   :  { %v177_v54 = vmul.f32 %v174_v52, %v16_v40 }
  0x8c   :  { %v67_v12 = vmax.f32 %v65_v10, %v66_v11 }
  0x8d   :  { %178 = vst [vmem:[#allocation2] sm:$0x3f] %v177_v54 }
  0x8e   :  { %v68_v13 = vrot.slane %v67_v12, 1 }
  0x90   :  { %v69_v14 = vmax.f32 %v67_v12, %v68_v13 }
  0x92   :  { %v70_v15 = vsub.f32 %v60_v7, %v69_v14 }
  0x94   :  { %v71_v16 = vmul.f32 1.442695, %v70_v15 }
  0x96   :  { %206 = vpow2.f32 %v71_v16 }
  0x9c   :  { %v207_v17 = vpop.eup %206 }
  0x9d   :  { %v73_v18 = vsel %vm62_vm1, %v207_v17, 0.0 }
  0x9e   :  { %v74_v19 = vrot.slane %v73_v18, 4 }
  0xa0   :  { %v75_v20 = vadd.f32 %v74_v19, %v73_v18 }
  0xa2   :  { %v76_v26 = vrot.slane %v75_v20, 2 }
  0xa4   :  { %v77_v28 = vadd.f32 %v76_v26, %v75_v20 }
  0xa6   :  { %v78_v29 = vrot.slane %v77_v28, 1 }
  0xa8   :  { %v79_v30 = vadd.f32 %v78_v29, %v77_v28 }
  0xaa   :  { %208 = vrcp.f32 %v79_v30  ;;  %v91_v34 = vand.u32 2147483648, %v79_v30  ;;  %v89_v36 = vand.u32 2147483647, %v79_v30  ;;  %vm85_vm3 = vweird.f32 %v79_v30 }
  0xac   :  { %v92_v38 = vor.u32 1.1754944e-38, %v91_v34  ;;  %vm90_vm5 = vcmp.eq.f32.partialorder %v89_v36, 8.507059e+37 }
  0xb0   :  { %v209_v31 = vpop.eup %208 }
  0xb1   :  { %v81_v32 = vmul.f32 %v209_v31, %v79_v30  ;;  %vm86_vm2 = vweird.f32 %v209_v31 }
  0xb2   :  { %vm87_vm4 = vmor %vm85_vm3, %vm86_vm2 }
  0xb3   :  { %v82_v33 = vsub.f32 1.0, %v81_v32 }
  0xb5   :  { %v83_v35 = vmul.f32 %v209_v31, %v82_v33 }
  0xb7   :  { %v84_v37 = vadd.f32 %v209_v31, %v83_v35 }
  0xb9   :  { %v88_v39 = vsel %vm87_vm4, %v209_v31, %v84_v37 }
  0xba   :  { %v93_v41 = vsel %vm90_vm5, %v92_v38, %v88_v39 }
  0xbb   :  { %v94_v42 = vmul.f32 %v207_v17, %v93_v41 }
  0xbd   :  { %v95_v43 = vmul.f32 %v94_v42, %v16_v40 }
  0xbf   :  { %198 = vmatpush.msk.msra.mxu1 %vm62_vm1, %v95_v43  ;;  %202 = vmatpush.msk.msra.mxu3 %vm62_vm1, %v95_v43 }
  0xc0   :  { %200 = vmatmul.msk.f32.vlgmr.msra.gmra.mxu3 %vm96_vm6, %v20_v44  ;;  %199 = vmatmul.msk.f32.vlgmr.msra.gmra.mxu1 %vm96_vm6, %v19_v45 }
 0x13d   :  { %v123_v56 = vpop.f32.mrf.mxu1 }
 0x13e   :  { %v129_v57 = vsub.f32 %v123_v56, %v263_v1 }
 0x140   :  { %v131_v58 = vadd.f32 1e-06, %v129_v57 }
 0x142   :  { %v133_v61 = vmul.f32 %v131_v58, %v131_v58 }
 0x143   :  { %v126_v59 = vpop.f32.mrf.mxu3 }
 0x144   :  { %v130_v60 = vsub.f32 %v126_v59, %v258_v0 }
 0x146   :  { %v132_v62 = vadd.f32 1e-06, %v130_v60 }
 0x148   :  { %v134_v63 = vmul.f32 %v132_v62, %v132_v62 }
 0x14a   :  { %v135_v2 = vadd.f32 %v134_v63, %v133_v61 }
 0x14c   :  { %v136_v3 = vrot.slane %v135_v2, 4 }
 0x14e   :  { %v137_v4 = vadd.f32 %v136_v3, %v135_v2 }
 0x150   :  { %v138_v5 = vrot.slane %v137_v4, 2 }
 0x152   :  { %v139_v6 = vadd.f32 %v138_v5, %v137_v4 }
 0x154   :  { %v140_v7 = vrot.slane %v139_v6, 1 }
 0x156   :  { %v141_v8 = vadd.f32 %v140_v7, %v139_v6 }
 0x158   :  { %210 = vrsqrt.f32 %v141_v8  ;;  %vm149_vm7 = vcmp.eq.f32.partialorder %v141_v8, inf  ;;  %v152_v14 = vand.u32 2147483648, %v141_v8  ;;  %vm151_vm8 = vcmp.eq.f32.partialorder %v141_v8, 0.0 }
 0x15e   :  { %v211_v9 = vpop.eup %210 }
 0x15f   :  { %v143_v10 = vmul.f32 %v211_v9, %v141_v8 }
 0x161   :  { %v144_v11 = vmul.f32 %v211_v9, %v143_v10 }
 0x163   :  { %v145_v12 = vmul.f32 0.5, %v144_v11 }
 0x165   :  { %v146_v1 = vsub.f32 1.5, %v145_v12 }
 0x167   :  { %v147_v13 = vmul.f32 %v211_v9, %v146_v1 }
 0x169   :  { %v148_v0 = vmul.f32 %v147_v13, %v141_v8 }
 0x16b   :  { %v150_v15 = vsel %vm149_vm7, %v141_v8, %v148_v0 }
 0x16c   :  { %v153_v16 = vsel %vm151_vm8, %v152_v14, %v150_v15 }
 0x16d   :  { %180 = vst [vmem:[#allocation2 + $0x7] sm:$0x1] %v153_v16 }
 0x16e   :  { %191 = dma.vmem_to_hbm [thread:$0]  %s187_s1, 128, %s189_s5, [#allocation3]  }
 0x16f   :  { %236 = dma.done.wait [#allocation3], 128  }
 0x170   :  { %237 = vsyncadd [#allocation3], 4294967168 }
 0x171   :  { %196 = vsyncpa [#allocation3], 1 }

</bundles_post_ra>
